<compile_context>
chip_gen: v7x
topology: tpu7x:2x2x1
jax: 0.10.0
libtpu: 0.0.40
codegen_flags: <defaults>
</compile_context>

<pallas_src>
import functools

import jax
import jax.numpy as jnp
from jax.experimental import pallas as pl
from jax.experimental.pallas import tpu as pltpu


# ---------------------------------------------------------------------------
# Hardware-aware VMEM budgets.
# ---------------------------------------------------------------------------
@functools.lru_cache(maxsize=1)
def _vmem_capacity_bytes():
    try:
        return int(pltpu.get_tpu_info().vmem_capacity_bytes)
    except Exception:
        return 64 * 1024 * 1024  # v7x-safe fallback if the query is unavailable


def _round_up(x, m):
    return (x + m - 1) // m * m


def _pick_tile(dim, candidates):
    for c in candidates:
        if dim % c == 0:
            return c
    return dim  # unreachable here: dim is always a multiple of 128


def _pick_col_block(h):
    """Column-block width for the fused path (must divide H and be a multiple
    of 128, else fall back to the full width)."""
    if h % 128 != 0:
        return h
    for th in (512, 384, 256, 128):
        if h % th == 0 and h // th >= 2:
            return th
    return h


# ---------------------------------------------------------------------------
# Path 1: fully fused kernel — adjacency resident in VMEM, gridded over
# hidden-column blocks ("parallel" -> both TensorCores on v7x).
# ---------------------------------------------------------------------------
def _fused_hyperconv_kernel(steps, inv_scale, a_ref, h_ref, o_ref):
    a = a_ref[...]                         # (N, N) compute_dtype (bf16 by default)
    cur = h_ref[...]                       # (N, th) float32
    acc = cur
    for _ in range(steps):                 # static -> unrolled
        cur = jnp.dot(a, cur.astype(a_ref.dtype),
                      preferred_element_type=jnp.float32)
        acc = acc + cur
    o_ref[...] = (acc * inv_scale).astype(o_ref.dtype)


def _fused_hyperconv(adjacency, hidden, steps, th, vmem_limit):
    N, H = hidden.shape
    # TODO(synk): pipeline_mode=pl.Buffered(1) on adjacency would drop its
    # double buffer and raise the fused-path N cutoff further.
    return pl.pallas_call(
        functools.partial(_fused_hyperconv_kernel, steps, 1.0 / float(steps + 1)),
        out_shape=jax.ShapeDtypeStruct((N, H), jnp.float32),
        grid=(H // th,),
        in_specs=[
            pl.BlockSpec((N, N), lambda j: (0, 0)),   # adjacency: VMEM resident
            pl.BlockSpec((N, th), lambda j: (0, j)),  # hidden column block
        ],
        out_specs=pl.BlockSpec((N, th), lambda j: (0, j)),
        compiler_params=pltpu.CompilerParams(
            dimension_semantics=("parallel",),
            vmem_limit_bytes=int(vmem_limit),
        ),
    )(adjacency, hidden)


# ---------------------------------------------------------------------------
# Path 2: tiled fallback — one pallas_call per propagation step.
# K-reduction in an f32 VMEM scratch; running-sum add fused in the epilogue.
# The final step only emits the scaled running sum (no dead `cur` writeback).
# ---------------------------------------------------------------------------
def _tiled_step_kernel(a_ref, x_ref, acc_in_ref, cur_out_ref, acc_out_ref, acc_sc):
    k = pl.program_id(2)

    @pl.when(k == 0)
    def _():
        acc_sc[...] = jnp.zeros_like(acc_sc)

    acc_sc[...] += jnp.dot(a_ref[...], x_ref[...],
                           preferred_element_type=jnp.float32)

    @pl.when(k == pl.num_programs(2) - 1)
    def _():
        cur_out_ref[...] = acc_sc[...].astype(cur_out_ref.dtype)
        acc_out_ref[...] = acc_in_ref[...] + acc_sc[...]


def _tiled_last_step_kernel(scale, a_ref, x_ref, acc_in_ref, out_ref, acc_sc):
    k = pl.program_id(2)

    @pl.when(k == 0)
    def _():
        acc_sc[...] = jnp.zeros_like(acc_sc)

    acc_sc[...] += jnp.dot(a_ref[...], x_ref[...],
                           preferred_element_type=jnp.float32)

    @pl.when(k == pl.num_programs(2) - 1)
    def _():
        out_ref[...] = ((acc_in_ref[...] + acc_sc[...]) * scale).astype(out_ref.dtype)


def _tiled_specs(tm, tn, tk):
    return [
        pl.BlockSpec((tm, tk), lambda i, j, k: (i, k)),  # adjacency tile
        pl.BlockSpec((tk, tn), lambda i, j, k: (k, j)),  # cur tile
        pl.BlockSpec((tm, tn), lambda i, j, k: (i, j)),  # running-sum tile
    ]
    # TODO(synk): pipeline_mode=pl.Buffered(3) on the adjacency stream (v7x)
    # once validated on the installed jax version.


def _tiled_step(adjacency, x, acc, *, tm, tn, tk, vmem_limit, compute_dtype):
    Np = adjacency.shape[0]
    Hp = x.shape[1]
    grid = (Np // tm, Hp // tn, Np // tk)
    return pl.pallas_call(
        _tiled_step_kernel,
        out_shape=(
            jax.ShapeDtypeStruct((Np, Hp), compute_dtype),  # new cur = A @ x
            jax.ShapeDtypeStruct((Np, Hp), jnp.float32),    # new running sum
        ),
        grid_spec=pltpu.PrefetchScalarGridSpec(
            num_scalar_prefetch=0,
            grid=grid,
            in_specs=_tiled_specs(tm, tn, tk),
            out_specs=[
                pl.BlockSpec((tm, tn), lambda i, j, k: (i, j)),
                pl.BlockSpec((tm, tn), lambda i, j, k: (i, j)),
            ],
            scratch_shapes=[pltpu.VMEM((tm, tn), jnp.float32)],
        ),
        compiler_params=pltpu.CompilerParams(
            dimension_semantics=("parallel", "parallel", "arbitrary"),
            vmem_limit_bytes=int(vmem_limit),
        ),
    )(adjacency, x, acc)


def _tiled_last_step(adjacency, x, acc, scale, *, tm, tn, tk, vmem_limit):
    Np = adjacency.shape[0]
    Hp = x.shape[1]
    grid = (Np // tm, Hp // tn, Np // tk)
    return pl.pallas_call(
        functools.partial(_tiled_last_step_kernel, scale),
        out_shape=jax.ShapeDtypeStruct((Np, Hp), jnp.float32),
        grid_spec=pltpu.PrefetchScalarGridSpec(
            num_scalar_prefetch=0,
            grid=grid,
            in_specs=_tiled_specs(tm, tn, tk),
            out_specs=pl.BlockSpec((tm, tn), lambda i, j, k: (i, j)),
            scratch_shapes=[pltpu.VMEM((tm, tn), jnp.float32)],
        ),
        compiler_params=pltpu.CompilerParams(
            dimension_semantics=("parallel", "parallel", "arbitrary"),
            vmem_limit_bytes=int(vmem_limit),
        ),
    )(adjacency, x, acc)


# ---------------------------------------------------------------------------
# Public wrapper.
# ---------------------------------------------------------------------------
@functools.partial(jax.jit, static_argnames=("steps", "compute_dtype", "force_tiled"))
def hyper_conv(hidden, adjacency, steps=1, compute_dtype=jnp.bfloat16,
               force_tiled=False):
    """Pallas implementation of HyperConv.forward.

    hidden:    (N, H) float32
    adjacency: (N, N) float32 (dense representation of the sparse adjacency)
    compute_dtype: MXU input dtype (bf16 default; float32 for exact semantics).
    Accumulation is always float32; output is float32.
    """
    hidden = hidden.astype(jnp.float32)
    if steps == 0:  # sum([hidden]) / 1
        return hidden
    adjacency = adjacency.astype(compute_dtype)
    N, H = hidden.shape
    ebytes = jnp.dtype(compute_dtype).itemsize

    capacity = _vmem_capacity_bytes()
    fused_vmem_limit = int(capacity * 0.75)
    fused_budget = int(fused_vmem_limit * 0.7)   # headroom for unrolled-loop temps
    tiled_vmem_limit = min(int(capacity * 0.625), 48 * 1024 * 1024)

    # Fused-path working-set estimate (per hidden-column block, with Pallas'
    # default double buffering and unrolled-loop temporaries included).
    th = _pick_col_block(H)
    fused_bytes = 2 * N * N * ebytes + 8 * N * th * 4

    if (not force_tiled) and fused_bytes <= fused_budget:
        return _fused_hyperconv(adjacency, hidden, steps, th, fused_vmem_limit)

    # --- Tiled fallback ---
    # Pad to lane/sublane-friendly multiples of 128; pick the largest tiles
    # that divide the padded problem.  tn covers the full hidden width when
    # Hp <= 512 so adjacency is never re-streamed across the H axis.
    # TODO(synk): mask the ragged K/M tail in-kernel (broadcasted_iota vs N)
    # instead of materializing a padded adjacency copy in HBM.
    # TODO(synk): for large N with small H, keep cur/acc resident in VMEM
    # across all steps and stream adjacency via pltpu.emit_pipeline.
    Np = _round_up(N, 128)
    Hp = _round_up(H, 128)
    tm = _pick_tile(Np, (512, 256, 128))
    tn = Hp if Hp <= 512 else _pick_tile(Hp, (512, 256, 128))
    tk = _pick_tile(Np, (1024, 512, 256, 128))

    if Np != N:
        adjacency = jnp.pad(adjacency, ((0, Np - N), (0, Np - N)))
    if (Np, Hp) != (N, H):
        hidden = jnp.pad(hidden, ((0, Np - N), (0, Hp - H)))

    acc = hidden                          # f32 running sum (starts with hidden)
    cur = hidden.astype(compute_dtype)    # MXU input stream
    for _ in range(steps - 1):
        cur, acc = _tiled_step(adjacency, cur, acc, tm=tm, tn=tn, tk=tk,
                               vmem_limit=tiled_vmem_limit,
                               compute_dtype=compute_dtype)
    out = _tiled_last_step(adjacency, cur, acc, 1.0 / float(steps + 1),
                           tm=tm, tn=tn, tk=tk, vmem_limit=tiled_vmem_limit)
    return out[:N, :H]


# ---------------------------------------------------------------------------
# Reference + self-test.
# ---------------------------------------------------------------------------
def hyper_conv_reference(hidden, adjacency, steps=1):
    hidden = hidden.astype(jnp.float32)
    adjacency = adjacency.astype(jnp.float32)
    final = [hidden]
    for _ in range(steps):
        final.append(adjacency @ final[-1])
    return jnp.stack(final, axis=0).sum(0) / float(steps + 1)


def _make_inputs(key, n, h):
    k_hidden, k_adj = jax.random.split(key)
    hidden = jax.random.normal(k_hidden, (n, h), dtype=jnp.float32)
    raw = jax.random.uniform(k_adj, (n, n), dtype=jnp.float32)
    mask = (raw > 0.7).astype(jnp.float32)  # ~30% non-zeros ("sparse-like")
    adjacency = mask / jnp.maximum(mask.sum(axis=1, keepdims=True), 1.0)
    return hidden, adjacency


def _check(out, ref, tol, name):
    assert out.shape == ref.shape, name
    assert jnp.allclose(out, ref, atol=tol, rtol=tol), name


if __name__ == "__main__":
    key = jax.random.PRNGKey(0)
    k0, k1 = jax.random.split(key)

    # --- Case 1: small aligned shape (fused path + forced tiled). ---
    N, H, steps = 128, 128, 2
    hidden, adjacency = _make_inputs(k0, N, H)
    ref = hyper_conv_reference(hidden, adjacency, steps=steps)

    out = jax.block_until_ready(hyper_conv(hidden, adjacency, steps=steps))
    _check(out, ref, 2e-2, "fused bf16 mismatch")

    out = jax.block_until_ready(
        hyper_conv(hidden, adjacency, steps=steps, compute_dtype=jnp.float32))
    _check(out, ref, 1e-4, "fused f32 mismatch")

    out = jax.block_until_ready(
        hyper_conv(hidden, adjacency, steps=steps, force_tiled=True))
    _check(out, ref, 2e-2, "tiled bf16 mismatch")

    out = jax.block_until_ready(
        hyper_conv(hidden, adjacency, steps=steps, compute_dtype=jnp.float32,
                   force_tiled=True))
    _check(out, ref, 1e-4, "tiled f32 mismatch")

    # --- Case 2: ragged shape (fused handles it unpadded; tiled pads). ---
    N2, H2, steps2 = 200, 96, 3
    hidden2, adjacency2 = _make_inputs(k1, N2, H2)
    ref2 = hyper_conv_reference(hidden2, adjacency2, steps=steps2)

    out2 = jax.block_until_ready(hyper_conv(hidden2, adjacency2, steps=steps2))
    _check(out2, ref2, 2e-2, "ragged fused bf16 mismatch")

    out2 = jax.block_until_ready(
        hyper_conv(hidden2, adjacency2, steps=steps2, compute_dtype=jnp.float32,
                   force_tiled=True))
    _check(out2, ref2, 1e-4, "ragged tiled f32 mismatch")

    out2 = jax.block_until_ready(
        hyper_conv(hidden2, adjacency2, steps=steps2, force_tiled=True))
    _check(out2, ref2, 2e-2, "ragged tiled bf16 mismatch")

    # --- Case 3: degenerate steps=0 (identity / (0+1)). ---
    out0 = jax.block_until_ready(hyper_conv(hidden, adjacency, steps=0))
    _check(out0, hidden, 1e-6, "steps=0 mismatch")

    print("KERNEL_OK")
</pallas_src>

<mosaic_0001>
module attributes {stable_mosaic.version = 11 : i64} {
  func.func @_fused_hyperconv_kernel(%arg0: i32, %arg1: memref<128x128xbf16, #tpu.memory_space<vmem>>, %arg2: memref<128x128xf32, #tpu.memory_space<vmem>>, %arg3: memref<128x128xf32, #tpu.memory_space<vmem>>) attributes {dimension_semantics = [#tpu.dimension_semantics<parallel>], iteration_bounds = array<i64: 1>, scalar_prefetch = 0 : i64, scratch_operands = 0 : i64, tpu.core_type = #tpu.core_type<tc>, window_params = [{pipeline_mode = #tpu.pipeline_mode<synchronous>, transform_indices = @transform_0, window_bounds = array<i64: 128, 128>}, {transform_indices = @transform_1, window_bounds = array<i64: 128, 128>}, {transform_indices = @transform_2, window_bounds = array<i64: 128, 128>}]} {
    %c0 = arith.constant 0 : index
    %c0_0 = arith.constant 0 : index
    %0 = vector.load %arg1[%c0, %c0_0] : memref<128x128xbf16, #tpu.memory_space<vmem>>, vector<128x128xbf16>
    %c0_1 = arith.constant 0 : index
    %c0_2 = arith.constant 0 : index
    %1 = vector.load %arg2[%c0_1, %c0_2] : memref<128x128xf32, #tpu.memory_space<vmem>>, vector<128x128xf32>
    %2 = arith.truncf %1 : vector<128x128xf32> to vector<128x128xbf16>
    %cst = arith.constant dense<0.000000e+00> : vector<128x128xf32>
    %3 = tpu.matmul %0, %2, %cst {dimension_numbers = #tpu.dot_dimension_numbers<[1], [0], [0], [1], [0, 0, 1, 1], [], []>} : vector<128x128xbf16>, vector<128x128xbf16>, vector<128x128xf32> -> vector<128x128xf32>
    %4 = arith.addf %1, %3 : vector<128x128xf32>
    %5 = arith.truncf %3 : vector<128x128xf32> to vector<128x128xbf16>
    %cst_3 = arith.constant dense<0.000000e+00> : vector<128x128xf32>
    %6 = tpu.matmul %0, %5, %cst_3 {dimension_numbers = #tpu.dot_dimension_numbers<[1], [0], [0], [1], [0, 0, 1, 1], [], []>} : vector<128x128xbf16>, vector<128x128xbf16>, vector<128x128xf32> -> vector<128x128xf32>
    %7 = arith.addf %4, %6 : vector<128x128xf32>
    %cst_4 = arith.constant 0.333333343 : f32
    %8 = vector.broadcast %cst_4 : f32 to vector<128x128xf32>
    %9 = arith.mulf %7, %8 : vector<128x128xf32>
    %c0_5 = arith.constant 0 : index
    %c0_6 = arith.constant 0 : index
    %10 = vector.load %arg3[%c0_5, %c0_6] : memref<128x128xf32, #tpu.memory_space<vmem>>, vector<128x128xf32>
    tpu.vector_store %arg3[%c0_5, %c0_6], %9 {strides = array<i32>} : memref<128x128xf32, #tpu.memory_space<vmem>>, vector<128x128xf32>,
    return
  }
  func.func @transform_0(%arg0: i32) -> (i32, i32) {
    %c0_i32 = arith.constant 0 : i32
    %c0_i32_0 = arith.constant 0 : i32
    %c0_i32_1 = arith.constant 0 : i32
    return %c0_i32, %c0_i32_0 : i32, i32
  }
  func.func @transform_1(%arg0: i32) -> (i32, i32) {
    %c0_i32 = arith.constant 0 : i32
    %c0_i32_0 = arith.constant 0 : i32
    return %c0_i32, %arg0 : i32, i32
  }
  func.func @transform_2(%arg0: i32) -> (i32, i32) {
    %c0_i32 = arith.constant 0 : i32
    %c0_i32_0 = arith.constant 0 : i32
    return %c0_i32, %arg0 : i32, i32
  }
}

</mosaic_0001>

<bundles_post_ra>
// kernel: hyper_conv.1
= control target key start
LH: loop header
LB: loop body
LE: loop exit
PB: predicated region body
PF: predicated region fallthrough
CT: control target
= control target key end

     0   :  { %s720_s0 = inlined_call_operand.vmem [shape: bf16[128,128], index: 0, kind: input, shape index: {}]   ;;  %s721_s1 = inlined_call_operand.vmem [shape: f32[128,128], index: 1, kind: input, shape index: {}]   ;;  %s722_s2 = inlined_call_operand.hbm [shape: f32[128,128], index: 2, kind: output, shape index: {}]  }
   0x1   :  { %v543_v0 = vld [vmem:[%s721_s1] sm:$0xff]  ;;  %v548_v1 = vld [vmem:[%s721_s1 + $0x8] sm:$0xff]  ;;  %v553_v2 = vld [vmem:[%s721_s1 + $0x10] sm:$0xff] }
   0x2   :  { %v45_v3 = vpack.c.bf16 %v548_v1, %v543_v0  ;;  %v560_v4 = vld [vmem:[%s721_s1 + $0x18] sm:$0xff]  ;;  %v567_v6 = vld [vmem:[%s721_s1 + $0x20] sm:$0xff]  ;;  %v572_v7 = vld [vmem:[%s721_s1 + $0x28] sm:$0xff] }
   0x3   :  { %v46_v5 = vpack.c.bf16 %v560_v4, %v553_v2  ;;  %v577_v8 = vld [vmem:[%s721_s1 + $0x30] sm:$0xff]  ;;  %v47_v9 = vpack.c.bf16 %v572_v7, %v567_v6  ;;  %v584_v10 = vld [vmem:[%s721_s1 + $0x38] sm:$0xff]  ;;  %v490_v11 = vld [vmem:[%s720_s0] sm:$0xff]  }
   0x4   :  { %423 = vmatprep.subr.bf16.mxu0 %v45_v3  ;;  %439 = vmatprep.mubr.bf16.mxu0 %v490_v11  ;;  %v48_v12 = vpack.c.bf16 %v584_v10, %v577_v8  ;;  %v594_v13 = vld [vmem:[%s721_s1 + $0x40] sm:$0xff]  ;;  %v599_v14 = vld [vmem:[%s721_s1 + $0x48] sm:$0xff] }
   0x5   :  { %424 = vmatpush3.bf16.msra.mxu0 %v45_v3  ;;  %471 = vmatprep.mubr.bf16.mxu1 %v490_v11  ;;  %v49_v15 = vpack.c.bf16 %v599_v14, %v594_v13 }
   0x6   :  { %425 = vmatprep.subr.bf16.mxu0 %v46_v5 }
   0x9   :  { %426 = vmatpush3.bf16.msra.mxu0 %v46_v5 }
   0xa   :  { %427 = vmatprep.subr.bf16.mxu0 %v47_v9 }
   0xd   :  { %428 = vmatpush3.bf16.msra.mxu0 %v47_v9 }
   0xe   :  { %429 = vmatprep.subr.bf16.mxu0 %v48_v12 }
   0xf   :  { %7 = vsyncpa [#allocation3], 0  ;;  %v606_v16 = vld [vmem:[%s721_s1 + $0x50] sm:$0xff]  ;;  %v611_v17 = vld [vmem:[%s721_s1 + $0x58] sm:$0xff] }
  0x10   :  { %v50_v18 = vpack.c.bf16 %v611_v17, %v606_v16  ;;  %v618_v19 = vld [vmem:[%s721_s1 + $0x60] sm:$0xff]  ;;  %v623_v20 = vld [vmem:[%s721_s1 + $0x68] sm:$0xff]  ;;  %v630_v22 = vld [vmem:[%s721_s1 + $0x70] sm:$0xff] }
  0x11   :  { %430 = vmatpush3.bf16.msra.mxu0 %v48_v12  ;;  %v51_v21 = vpack.c.bf16 %v623_v20, %v618_v19  ;;  %v635_v23 = vld [vmem:[%s721_s1 + $0x78] sm:$0xff]  ;;  %v491_v25 = vld [vmem:[%s720_s0 + $0x8] sm:$0xff]   ;;  %v492_v26 = vld [vmem:[%s720_s0 + $0x10] sm:$0xff]  }
  0x12   :  { %431 = vmatprep.subr.bf16.mxu0 %v49_v15  ;;  %v52_v24 = vpack.c.bf16 %v635_v23, %v630_v22  ;;  %v493_v27 = vld [vmem:[%s720_s0 + $0x18] sm:$0xff]   ;;  %v494_v28 = vld [vmem:[%s720_s0 + $0x20] sm:$0xff]   ;;  %v495_v29 = vld [vmem:[%s720_s0 + $0x28] sm:$0xff]  }
  0x13   :  { %v496_v30 = vld [vmem:[%s720_s0 + $0x30] sm:$0xff]   ;;  %v497_v31 = vld [vmem:[%s720_s0 + $0x38] sm:$0xff]   ;;  %s522_s0 = smov [#allocation2]  }
  0x14   :  { %s372_s28 = sshll.u32 %s522_s0, 4  ;;  %s373_s28 = int_to_ptr.vmem [resolvable:$true] %s372_s28 }
  0x15   :  { %432 = vmatpush3.bf16.msra.mxu0 %v49_v15  ;;  %s498_s29 = scalar_lea.vmem %s373_s28, 2048  ;;  %p503_p1 = scmp.lt.s32.totalorder %s373_s28, %s373_s28 }
  0x16   :  { %433 = vmatprep.subr.bf16.mxu0 %v50_v18  ;;  %p499_p0 = scmp.ne.s32.totalorder %s373_s28, %s498_s29  ;;  %p504_p2 = scmp.lt.s32.totalorder %s498_s29, %s498_s29 }
  0x18   :  { %p505_p3 = por %p504_p2, %p503_p1 }
  0x19   :  { %434 = vmatpush3.bf16.msra.mxu0 %v50_v18 }
  0x1a   :  { %435 = vmatprep.subr.bf16.mxu0 %v51_v21  ;;  %p506_p4 = pnand %p505_p3, %p499_p0 }
  0x1d   :  { %436 = vmatpush3.bf16.msra.mxu0 %v51_v21 }
  0x1e   :  { %437 = vmatprep.subr.bf16.mxu0 %v52_v24 }
  0x21   :  { %438 = vmatpush3.bf16.msra.mxu0 %v52_v24 }
  0x24   :  { %440 = vmatmul.mubr.bf16.vlgmr.msra.gmra.mrb[0].mxu0 %v491_v25 }
  0x25   :  { %443 = vmatprep.mubr.bf16.mxu0 %v492_v26 }
  0x2c   :  { %444 = vmatmul.mubr.bf16.gmra.mrb[4].mxu0 %v493_v27 }
  0x2d   :  { %447 = vmatprep.mubr.bf16.mxu0 %v494_v28 }
  0x34   :  { %448 = vmatmul.mubr.bf16.gmra.mrb[8].mxu0 %v495_v29 }
  0x35   :  { %451 = vmatprep.mubr.bf16.mxu0 %v496_v30 }
  0x3c   :  { %452 = vmatmul.mubr.bf16.gmra.mrb[12].mxu0 %v497_v31 }
  0xf7   :  { %v441_v32 = vpop.f32.mrb[0].mxu0 }
  0xf8   :  { %v135_v33 = vpop.f32.mrb[1].mxu0  ;;  %v200_v56 = vadd.f32 %v441_v32, %v553_v2 }
  0xf9   :  { %v442_v34 = vpop.f32.mrb[2].mxu0  ;;  %v198_v57 = vadd.f32 %v135_v33, %v543_v0 }
  0xfa   :  { %v215_v35 = vpack.c.bf16 %v442_v34, %v441_v32  ;;  %v138_v36 = vpop.f32.mrb[3].mxu0  ;;  %v201_v59 = vadd.f32 %v442_v34, %v560_v4 }
  0xfb   :  { %v214_v37 = vpack.c.bf16 %v138_v36, %v135_v33  ;;  %v199_v62 = vadd.f32 %v138_v36, %v548_v1 }
  0xfd   :  { %455 = vmatprep.subr.bf16.mxu1 %v214_v37 }
  0xfe   :  { %456 = vmatpush3.bf16.msra.mxu1 %v214_v37 }
  0xff   :  { %v445_v38 = vpop.f32.mrb[4].mxu0  ;;  %457 = vmatprep.subr.bf16.mxu1 %v215_v35 }
 0x100   :  { %v151_v39 = vpop.f32.mrb[5].mxu0  ;;  %v204_v0 = vadd.f32 %v445_v38, %v577_v8 }
 0x101   :  { %v446_v40 = vpop.f32.mrb[6].mxu0  ;;  %v202_v4 = vadd.f32 %v151_v39, %v567_v6 }
 0x102   :  { %v217_v41 = vpack.c.bf16 %v446_v40, %v445_v38  ;;  %v154_v42 = vpop.f32.mrb[7].mxu0  ;;  %458 = vmatpush3.bf16.msra.mxu1 %v215_v35  ;;  %v205_v1 = vadd.f32 %v446_v40, %v584_v10 }
 0x103   :  { %v216_v43 = vpack.c.bf16 %v154_v42, %v151_v39 }
 0x105   :  { %459 = vmatprep.subr.bf16.mxu1 %v216_v43 }
 0x106   :  { %460 = vmatpush3.bf16.msra.mxu1 %v216_v43 }
 0x107   :  { %v660_v44 = vpop.f32.mrb[8].mxu0  ;;  %461 = vmatprep.subr.bf16.mxu1 %v217_v41 }
 0x108   :  { %v662_v45 = vpop.f32.mrb[9].mxu0  ;;  %v208_v6 = vadd.f32 %v660_v44, %v606_v16 }
 0x109   :  { %v664_v46 = vpop.f32.mrb[10].mxu0  ;;  %v206_v10 = vadd.f32 %v662_v45, %v594_v13 }
 0x10a   :  { %v219_v47 = vpack.c.bf16 %v664_v46, %v660_v44  ;;  %v668_v48 = vpop.f32.mrb[11].mxu0  ;;  %462 = vmatpush3.bf16.msra.mxu1 %v217_v41  ;;  %v209_v35 = vadd.f32 %v664_v46, %v611_v17 }
 0x10b   :  { %v218_v49 = vpack.c.bf16 %v668_v48, %v662_v45  ;;  %v207_v38 = vadd.f32 %v668_v48, %v599_v14 }
 0x10d   :  { %463 = vmatprep.subr.bf16.mxu1 %v218_v49 }
 0x10e   :  { %464 = vmatpush3.bf16.msra.mxu1 %v218_v49 }
 0x10f   :  { %v672_v50 = vpop.f32.mrb[12].mxu0  ;;  %465 = vmatprep.subr.bf16.mxu1 %v219_v47 }
 0x110   :  { %v674_v51 = vpop.f32.mrb[13].mxu0  ;;  %v212_v45 = vadd.f32 %v672_v50, %v630_v22 }
 0x111   :  { %v676_v52 = vpop.f32.mrb[14].mxu0  ;;  %v210_v17 = vadd.f32 %v674_v51, %v618_v19 }
 0x112   :  { %v221_v53 = vpack.c.bf16 %v676_v52, %v672_v50  ;;  %v680_v54 = vpop.f32.mrb[15].mxu0  ;;  %466 = vmatpush3.bf16.msra.mxu1 %v219_v47  ;;  %v213_v46 = vadd.f32 %v676_v52, %v635_v23 }
 0x113   :  { %v220_v55 = vpack.c.bf16 %v680_v54, %v674_v51 }
 0x115   :  { %467 = vmatprep.subr.bf16.mxu1 %v220_v55 }
 0x116   :  { %468 = vmatpush3.bf16.msra.mxu1 %v220_v55 }
 0x117   :  { %469 = vmatprep.subr.bf16.mxu1 %v221_v53 }
 0x11a   :  { %470 = vmatpush3.bf16.msra.mxu1 %v221_v53  ;;  %v211_v53 = vadd.f32 %v680_v54, %v623_v20 }
 0x11d   :  { %472 = vmatmul.mubr.bf16.vlgmr.msra.gmra.mrb[0].mxu1 %v491_v25 }
 0x11e   :  { %475 = vmatprep.mubr.bf16.mxu1 %v492_v26  ;;  %v203_v26 = vadd.f32 %v154_v42, %v572_v7 }
 0x125   :  { %476 = vmatmul.mubr.bf16.gmra.mrb[4].mxu1 %v493_v27 }
 0x126   :  { %479 = vmatprep.mubr.bf16.mxu1 %v494_v28 }
 0x12d   :  { %480 = vmatmul.mubr.bf16.gmra.mrb[8].mxu1 %v495_v29 }
 0x12e   :  { %483 = vmatprep.mubr.bf16.mxu1 %v496_v30 }
 0x135   :  { %484 = vmatmul.mubr.bf16.gmra.mrb[12].mxu1 %v497_v31 }
 0x1f0   :  { %v473_v58 = vpop.f32.mrb[0].mxu1 }
 0x1f1   :  { %v321_v60 = vadd.f32 %v473_v58, %v200_v56  ;;  %v256_v61 = vpop.f32.mrb[1].mxu1 }
 0x1f2   :  { %v319_v63 = vadd.f32 %v256_v61, %v198_v57  ;;  %v474_v3 = vpop.f32.mrb[2].mxu1 }
 0x1f3   :  { %v337_v5 = vmul.f32 0.33333334, %v321_v60  ;;  %v322_v9 = vadd.f32 %v474_v3, %v201_v59  ;;  %v259_v11 = vpop.f32.mrb[3].mxu1 }
 0x1f4   :  { %v335_v12 = vmul.f32 0.33333334, %v319_v63  ;;  %v320_v15 = vadd.f32 %v259_v11, %v199_v62 }
 0x1f5   :  { %353 = vst [vmem:[#allocation2 + $0x10] sm:$0xff] %v337_v5  ;;  %v338_v18 = vmul.f32 0.33333334, %v322_v9 }
 0x1f6   :  { %351 = vst [vmem:[#allocation2] sm:$0xff] %v335_v12  ;;  %v336_v2 = vmul.f32 0.33333334, %v320_v15 }
 0x1f7   :  { %354 = vst [vmem:[#allocation2 + $0x18] sm:$0xff] %v338_v18 }
 0x1f8   :  { %352 = vst [vmem:[#allocation2 + $0x8] sm:$0xff] %v336_v2  ;;  %v477_v21 = vpop.f32.mrb[4].mxu1 }
 0x1f9   :  { %v325_v24 = vadd.f32 %v477_v21, %v204_v0  ;;  %v272_v25 = vpop.f32.mrb[5].mxu1 }
 0x1fa   :  { %v323_v27 = vadd.f32 %v272_v25, %v202_v4  ;;  %v478_v28 = vpop.f32.mrb[6].mxu1 }
 0x1fb   :  { %v341_v29 = vmul.f32 0.33333334, %v325_v24  ;;  %v326_v30 = vadd.f32 %v478_v28, %v205_v1  ;;  %v275_v31 = vpop.f32.mrb[7].mxu1 }
 0x1fc   :  { %v339_v32 = vmul.f32 0.33333334, %v323_v27  ;;  %v324_v33 = vadd.f32 %v275_v31, %v203_v26 }
 0x1fd   :  { %357 = vst [vmem:[#allocation2 + $0x30] sm:$0xff] %v341_v29  ;;  %v342_v8 = vmul.f32 0.33333334, %v326_v30 }
 0x1fe   :  { %355 = vst [vmem:[#allocation2 + $0x20] sm:$0xff] %v339_v32  ;;  %v340_v34 = vmul.f32 0.33333334, %v324_v33 }
 0x1ff   :  { %358 = vst [vmem:[#allocation2 + $0x38] sm:$0xff] %v342_v8 }
 0x200   :  { %356 = vst [vmem:[#allocation2 + $0x28] sm:$0xff] %v340_v34  ;;  %v481_v7 = vpop.f32.mrb[8].mxu1 }
 0x201   :  { %v329_v36 = vadd.f32 %v481_v7, %v208_v6  ;;  %v288_v37 = vpop.f32.mrb[9].mxu1 }
 0x202   :  { %v327_v39 = vadd.f32 %v288_v37, %v206_v10  ;;  %v482_v40 = vpop.f32.mrb[10].mxu1 }
 0x203   :  { %v345_v41 = vmul.f32 0.33333334, %v329_v36  ;;  %v330_v42 = vadd.f32 %v482_v40, %v209_v35  ;;  %v291_v43 = vpop.f32.mrb[11].mxu1 }
 0x204   :  { %v343_v16 = vmul.f32 0.33333334, %v327_v39  ;;  %v328_v44 = vadd.f32 %v291_v43, %v207_v38 }
 0x205   :  { %361 = vst [vmem:[#allocation2 + $0x50] sm:$0xff] %v345_v41  ;;  %v346_v47 = vmul.f32 0.33333334, %v330_v42 }
 0x206   :  { %359 = vst [vmem:[#allocation2 + $0x40] sm:$0xff] %v343_v16  ;;  %v344_v13 = vmul.f32 0.33333334, %v328_v44 }
 0x207   :  { %362 = vst [vmem:[#allocation2 + $0x58] sm:$0xff] %v346_v47 }
 0x208   :  { %360 = vst [vmem:[#allocation2 + $0x48] sm:$0xff] %v344_v13  ;;  %v485_v14 = vpop.f32.mrb[12].mxu1 }
 0x209   :  { %v333_v48 = vadd.f32 %v485_v14, %v212_v45  ;;  %v304_v49 = vpop.f32.mrb[13].mxu1 }
 0x20a   :  { %v331_v55 = vadd.f32 %v304_v49, %v210_v17  ;;  %v486_v56 = vpop.f32.mrb[14].mxu1 }
 0x20b   :  { %v349_v57 = vmul.f32 0.33333334, %v333_v48  ;;  %v334_v22 = vadd.f32 %v486_v56, %v213_v46  ;;  %v307_v50 = vpop.f32.mrb[15].mxu1 }
 0x20c   :  { %v347_v58 = vmul.f32 0.33333334, %v331_v55  ;;  %v332_v59 = vadd.f32 %v307_v50, %v211_v53 }
 0x20d   :  { %365 = vst [vmem:[#allocation2 + $0x70] sm:$0xff] %v349_v57  ;;  %v350_v19 = vmul.f32 0.33333334, %v334_v22 }
 0x20e   :  { %363 = vst [vmem:[#allocation2 + $0x60] sm:$0xff] %v347_v58  ;;  %v348_v51 = vmul.f32 0.33333334, %v332_v59 }
 0x20f   :  { %366 = vst [vmem:[#allocation2 + $0x78] sm:$0xff] %v350_v19 }
 0x210   :  { %364 = vst [vmem:[#allocation2 + $0x68] sm:$0xff] %v348_v51 }
 0x211   :  { %509 = shalt.err (!%p506_p4)
}
 0x212   :  { %s510_s4 = scalar_lea.hbm %s722_s2, 2048 }
 0x213   :  { %p511_p5 = scmp.ne.s32.totalorder %s722_s2, %s510_s4  ;;  %p514_p6 = scmp.lt.u32.totalorder %s510_s4, %s722_s2 }
 0x215   :  { %p516_p7 = pnand %p514_p6, %p511_p5 }
 0x217   :  { %519 = shalt.err (!%p516_p7)
}
 0x218   :  { %s523_s9 = smov 128   ;;  %s524_s10 = smov 8  }
 0x219   :  { %378 = dma.vmem_to_hbm [thread:$0]  %s373_s28, 2048, %s722_s2, [#allocation3], %s523_s9, %s523_s9, %s524_s10  }
 0x21a   :  { %520 = dma.done.wait [#allocation3], 2048  }
 0x21b   :  { %521 = vsyncadd [#allocation3], 4294965248 }
 0x21c   :  { %382 = vsyncpa [#allocation3], 1 }

</bundles_post_ra>
